<compile_context>
chip_gen: v6e
topology: v6e:2x2x1
jax: 0.10.0
libtpu: 0.0.40
codegen_flags: <defaults>
</compile_context>

<pallas_src>
from math import exp

import numpy as np
import jax
import jax.numpy as jnp
from jax import lax
from jax.experimental import pallas as pl
from jax.experimental.pallas import tpu as pltpu

WINDOW_SIZE = 11
SIGMA = 1.5
C1 = 0.01 ** 2
C2 = 0.03 ** 2


def gaussian_1d(window_size, sigma):
    g = np.array(
        [exp(-((x - window_size // 2) ** 2) / float(2 * sigma ** 2))
         for x in range(window_size)],
        dtype=np.float32,
    )
    return g / g.sum()


def band_matrix(n, g):
    """Banded Toeplitz matrix so (A @ x) == 1-D 'same' zero-padded conv."""
    half = len(g) // 2
    idx = np.arange(n)
    diff = idx[None, :] - idx[:, None] + half          # A[i, j] = g[j - i + half]
    valid = (diff >= 0) & (diff < len(g))
    return np.where(valid, g[np.clip(diff, 0, len(g) - 1)], 0.0).astype(np.float32)


def blur_matrix(h, w, window_size=WINDOW_SIZE, sigma=SIGMA):
    """K such that X_flat(P, H*W) @ K == 2-D 'same' zero-padded Gaussian blur."""
    g = gaussian_1d(window_size, sigma)
    return np.kron(band_matrix(h, g), band_matrix(w, g)).astype(np.float32)


def _ssim_kernel(x1_ref, x2_ref, k_ref, psum_ref):
    x1 = x1_ref[...]          # (B, H*W)  f32
    x2 = x2_ref[...]          # (B, H*W)  f32
    k = k_ref[...]            # (H*W, H*W) f32 blur matrix

    b = x1.shape[0]

    # Fuse the five blur operands into one stacked operand -> single MXU matmul.
    stacked = jnp.concatenate(
        [x1, x2, x1 * x1, x2 * x2, x1 * x2], axis=0)            # (5B, H*W)
    blurred = jnp.dot(stacked, k, preferred_element_type=jnp.float32)

    mu1 = blurred[0 * b:1 * b]
    mu2 = blurred[1 * b:2 * b]
    e11 = blurred[2 * b:3 * b]
    e22 = blurred[3 * b:4 * b]
    e12 = blurred[4 * b:5 * b]

    mu1_sq = mu1 * mu1
    mu2_sq = mu2 * mu2
    mu1_mu2 = mu1 * mu2
    sigma1_sq = e11 - mu1_sq
    sigma2_sq = e22 - mu2_sq
    sigma12 = e12 - mu1_mu2

    num = (2.0 * mu1_mu2 + C1) * (2.0 * sigma12 + C2)
    den = (mu1_sq + mu2_sq + C1) * (sigma1_sq + sigma2_sq + C2)
    ssim_map = num / den                                         # (B, H*W)

    # Lane-dense partial sum: reduce only along the sublane (plane) axis here;
    # the cross-lane reduction happens once, outside the kernel.
    psum_ref[...] = jnp.sum(ssim_map, axis=0, keepdims=True)     # (1, H*W)


def _pick_block_planes(p, hw, budget_bytes=4 << 20):
    """Largest divisor of p that keeps per-step live f32 data under budget."""
    # ~2 inputs x 2 pipeline buffers + 5 stacked + 5 blurred + ~10 temporaries
    per_plane_bytes = 24 * hw * 4
    cap = max(1, budget_bytes // per_plane_bytes)
    best = 1
    for b in range(1, p + 1):
        if p % b == 0 and b <= cap:
            best = b
    return best


def ssim_loss(img1, img2, window_size=WINDOW_SIZE, denominator=2):
    """Pallas SSIMLoss.forward: returns (1 - ssim(img1, img2)) / denominator."""
    n, c, h, w = img1.shape
    p = n * c
    hw = h * w

    x1 = img1.reshape(p, hw).astype(jnp.float32)
    x2 = img2.reshape(p, hw).astype(jnp.float32)
    kmat = jnp.asarray(blur_matrix(h, w, window_size))

    b = _pick_block_planes(p, hw)
    n_blocks = p // b

    psums = pl.pallas_call(
        _ssim_kernel,
        out_shape=jax.ShapeDtypeStruct((n_blocks, hw), jnp.float32),
        grid_spec=pltpu.PrefetchScalarGridSpec(
            num_scalar_prefetch=0,
            grid=(n_blocks,),
            in_specs=[
                pl.BlockSpec((b, hw), lambda i: (i, 0)),
                pl.BlockSpec((b, hw), lambda i: (i, 0)),
                pl.BlockSpec((hw, hw), lambda i: (0, 0)),
            ],
            out_specs=pl.BlockSpec((1, hw), lambda i: (i, 0)),
        ),
        compiler_params=pltpu.CompilerParams(
            dimension_semantics=("parallel",),
            vmem_limit_bytes=32 * 1024 * 1024,
        ),
    )(x1, x2, kmat)

    mean_ssim = jnp.sum(psums) / float(p * hw)
    return (1.0 - mean_ssim) / float(denominator)


def ssim_loss_ref(img1, img2, window_size=WINDOW_SIZE, denominator=2):
    """Pure-JAX reference matching the PyTorch module semantics."""
    N, C, H, W = img1.shape
    g = gaussian_1d(window_size, SIGMA)
    w2d = np.outer(g, g).astype(np.float32)
    window = jnp.asarray(np.broadcast_to(w2d, (C, 1, window_size, window_size)).copy())
    pad = window_size // 2

    def conv(x):
        return lax.conv_general_dilated(
            x, window, window_strides=(1, 1),
            padding=[(pad, pad), (pad, pad)],
            dimension_numbers=("NCHW", "OIHW", "NCHW"),
            feature_group_count=C)

    mu1 = conv(img1)
    mu2 = conv(img2)
    mu1_sq = mu1 ** 2
    mu2_sq = mu2 ** 2
    mu1_mu2 = mu1 * mu2
    sigma1_sq = conv(img1 * img1) - mu1_sq
    sigma2_sq = conv(img2 * img2) - mu2_sq
    sigma12 = conv(img1 * img2) - mu1_mu2
    ssim_map = ((2 * mu1_mu2 + C1) * (2 * sigma12 + C2)) / (
        (mu1_sq + mu2_sq + C1) * (sigma1_sq + sigma2_sq + C2))
    return (1.0 - jnp.mean(ssim_map)) / denominator


if __name__ == "__main__":
    key = jax.random.PRNGKey(0)
    k1, k2 = jax.random.split(key)
    img1 = jax.random.uniform(k1, (2, 4, 16, 16), dtype=jnp.float32)
    img2 = jax.random.uniform(k2, (2, 4, 16, 16), dtype=jnp.float32)

    loss = ssim_loss(img1, img2)
    jax.block_until_ready(loss)

    ref = ssim_loss_ref(img1, img2)
    np.testing.assert_allclose(np.asarray(loss), np.asarray(ref),
                               rtol=1e-4, atol=1e-6)
    print("KERNEL_OK")
</pallas_src>

<mosaic_0001>
module attributes {stable_mosaic.version = 11 : i64} {
  func.func @_ssim_kernel(%arg0: i32, %arg1: memref<8x256xf32, #tpu.memory_space<vmem>>, %arg2: memref<8x256xf32, #tpu.memory_space<vmem>>, %arg3: memref<256x256xf32, #tpu.memory_space<vmem>>, %arg4: memref<1x256xf32, #tpu.memory_space<vmem>>) attributes {dimension_semantics = [#tpu.dimension_semantics<parallel>], iteration_bounds = array<i64: 1>, scalar_prefetch = 0 : i64, scratch_operands = 0 : i64, tpu.core_type = #tpu.core_type<tc>, window_params = [{transform_indices = @transform_0, window_bounds = array<i64: 8, 256>}, {transform_indices = @transform_1, window_bounds = array<i64: 8, 256>}, {pipeline_mode = #tpu.pipeline_mode<synchronous>, transform_indices = @transform_2, window_bounds = array<i64: 256, 256>}, {transform_indices = @transform_3, window_bounds = array<i64: 1, 256>}]} {
    %c0 = arith.constant 0 : index
    %c0_0 = arith.constant 0 : index
    %0 = vector.load %arg1[%c0, %c0_0] : memref<8x256xf32, #tpu.memory_space<vmem>>, vector<8x256xf32>
    %c0_1 = arith.constant 0 : index
    %c0_2 = arith.constant 0 : index
    %1 = vector.load %arg2[%c0_1, %c0_2] : memref<8x256xf32, #tpu.memory_space<vmem>>, vector<8x256xf32>
    %c0_3 = arith.constant 0 : index
    %c0_4 = arith.constant 0 : index
    %2 = vector.load %arg3[%c0_3, %c0_4] : memref<256x256xf32, #tpu.memory_space<vmem>>, vector<256x256xf32>
    %3 = arith.mulf %0, %0 : vector<8x256xf32>
    %4 = arith.mulf %1, %1 : vector<8x256xf32>
    %5 = arith.mulf %0, %1 : vector<8x256xf32>
    %6 = tpu.concatenate %0, %1, %3, %4, %5 in 0 : vector<8x256xf32>, vector<8x256xf32>, vector<8x256xf32>, vector<8x256xf32>, vector<8x256xf32> -> vector<40x256xf32>
    %cst = arith.constant dense<0.000000e+00> : vector<40x256xf32>
    %7 = tpu.matmul %6, %2, %cst {dimension_numbers = #tpu.dot_dimension_numbers<[1], [0], [0], [1], [0, 0, 1, 1], [], []>} : vector<40x256xf32>, vector<256x256xf32>, vector<40x256xf32> -> vector<40x256xf32>
    %8 = vector.extract_strided_slice %7 {offsets = [0, 0], sizes = [8, 256], strides = [1, 1]} : vector<40x256xf32> to vector<8x256xf32>
    %9 = vector.extract_strided_slice %7 {offsets = [8, 0], sizes = [8, 256], strides = [1, 1]} : vector<40x256xf32> to vector<8x256xf32>
    %10 = vector.extract_strided_slice %7 {offsets = [16, 0], sizes = [8, 256], strides = [1, 1]} : vector<40x256xf32> to vector<8x256xf32>
    %11 = vector.extract_strided_slice %7 {offsets = [24, 0], sizes = [8, 256], strides = [1, 1]} : vector<40x256xf32> to vector<8x256xf32>
    %12 = vector.extract_strided_slice %7 {offsets = [32, 0], sizes = [8, 256], strides = [1, 1]} : vector<40x256xf32> to vector<8x256xf32>
    %13 = arith.mulf %8, %8 : vector<8x256xf32>
    %14 = arith.mulf %9, %9 : vector<8x256xf32>
    %15 = arith.mulf %8, %9 : vector<8x256xf32>
    %16 = arith.subf %10, %13 : vector<8x256xf32>
    %17 = arith.subf %11, %14 : vector<8x256xf32>
    %18 = arith.subf %12, %15 : vector<8x256xf32>
    %cst_5 = arith.constant 2.000000e+00 : f32
    %19 = vector.broadcast %cst_5 : f32 to vector<8x256xf32>
    %20 = arith.mulf %19, %15 : vector<8x256xf32>
    %cst_6 = arith.constant 9.99999974E-5 : f32
    %21 = vector.broadcast %cst_6 : f32 to vector<8x256xf32>
    %22 = arith.addf %20, %21 : vector<8x256xf32>
    %cst_7 = arith.constant 2.000000e+00 : f32
    %23 = vector.broadcast %cst_7 : f32 to vector<8x256xf32>
    %24 = arith.mulf %23, %18 : vector<8x256xf32>
    %cst_8 = arith.constant 8.99999984E-4 : f32
    %25 = vector.broadcast %cst_8 : f32 to vector<8x256xf32>
    %26 = arith.addf %24, %25 : vector<8x256xf32>
    %27 = arith.mulf %22, %26 : vector<8x256xf32>
    %28 = arith.addf %13, %14 : vector<8x256xf32>
    %cst_9 = arith.constant 9.99999974E-5 : f32
    %29 = vector.broadcast %cst_9 : f32 to vector<8x256xf32>
    %30 = arith.addf %28, %29 : vector<8x256xf32>
    %31 = arith.addf %16, %17 : vector<8x256xf32>
    %cst_10 = arith.constant 8.99999984E-4 : f32
    %32 = vector.broadcast %cst_10 : f32 to vector<8x256xf32>
    %33 = arith.addf %31, %32 : vector<8x256xf32>
    %34 = arith.mulf %30, %33 : vector<8x256xf32>
    %35 = arith.divf %27, %34 : vector<8x256xf32>
    %cst_11 = arith.constant dense<0.000000e+00> : vector<256xf32>
    %36 = vector.multi_reduction <add>, %35, %cst_11 [0] : vector<8x256xf32> to vector<256xf32>
    %37 = vector.shape_cast %36 : vector<256xf32> to vector<1x256xf32>
    %c0_12 = arith.constant 0 : index
    %c0_13 = arith.constant 0 : index
    %38 = vector.load %arg4[%c0_12, %c0_13] : memref<1x256xf32, #tpu.memory_space<vmem>>, vector<1x256xf32>
    tpu.vector_store %arg4[%c0_12, %c0_13], %37 {strides = array<i32>} : memref<1x256xf32, #tpu.memory_space<vmem>>, vector<1x256xf32>,
    return
  }
  func.func @transform_0(%arg0: i32) -> (i32, i32) {
    %c0_i32 = arith.constant 0 : i32
    %c0_i32_0 = arith.constant 0 : i32
    return %arg0, %c0_i32 : i32, i32
  }
  func.func @transform_1(%arg0: i32) -> (i32, i32) {
    %c0_i32 = arith.constant 0 : i32
    %c0_i32_0 = arith.constant 0 : i32
    return %arg0, %c0_i32 : i32, i32
  }
  func.func @transform_2(%arg0: i32) -> (i32, i32) {
    %c0_i32 = arith.constant 0 : i32
    %c0_i32_0 = arith.constant 0 : i32
    %c0_i32_1 = arith.constant 0 : i32
    return %c0_i32, %c0_i32_0 : i32, i32
  }
  func.func @transform_3(%arg0: i32) -> (i32, i32) {
    %c0_i32 = arith.constant 0 : i32
    %c0_i32_0 = arith.constant 0 : i32
    return %arg0, %c0_i32 : i32, i32
  }
}

</mosaic_0001>

<bundles_post_ra>
// kernel: tpu_custom_call.1
= control target key start
LH: loop header
LB: loop body
LE: loop exit
PB: predicated region body
PF: predicated region fallthrough
CT: control target
= control target key end

     0   :  { %8 = vsyncpa [#allocation3], 0  ;;  %s508_s0 = inlined_call_operand.hbm [shape: f32[8,256], index: 0, kind: input, shape index: {}]   ;;  %s509_s1 = inlined_call_operand.hbm [shape: f32[8,256], index: 1, kind: input, shape index: {}]   ;;  %s510_s2 = inlined_call_operand.hbm [shape: f32[256,256], index: 2, kind: input, shape index: {}]   ;;  %s511_s3 = inlined_call_operand.hbm [shape: f32[1,256], index: 3, kind: output, shape index: {}]  }
   0x1   :  { %9 = vsyncpa [#allocation6], 0 }
   0x2   :  { %10 = vsyncpa [#allocation4], 0  ;;  %s469_s12 = smov [#allocation5]   ;;  %s470_s14 = smov [#allocation2]  }
   0x3   :  { %s27_s13 = sshll.u32 %s469_s12, 4  ;;  %s17_s15 = sshll.u32 %s470_s14, 4  ;;  %s28_s13 = int_to_ptr.vmem [resolvable:$true] %s27_s13  ;;  %s18_s15 = int_to_ptr.vmem [resolvable:$true] %s17_s15 }
   0x4   :  { %s391_s16 = scalar_lea.vmem %s28_s13, 256  ;;  %p396_p1 = scmp.lt.s32.totalorder %s28_s13, %s28_s13 }
   0x5   :  { %p392_p0 = scmp.ne.s32.totalorder %s28_s13, %s391_s16  ;;  %p397_p2 = scmp.lt.s32.totalorder %s391_s16, %s391_s16 }
   0x7   :  { %p398_p3 = por %p397_p2, %p396_p1 }
   0x9   :  { %p399_p4 = pnand %p398_p3, %p392_p0 }
   0xb   :  { %402 = shalt.err (!%p399_p4)
}
   0xc   :  { %30 = dma.hbm_to_vmem [thread:$0]  %s509_s1, 256, %s28_s13, [#allocation6]  }
   0xd   :  { %s411_s19 = scalar_lea.vmem %s18_s15, 256  ;;  %p416_p6 = scmp.lt.s32.totalorder %s18_s15, %s18_s15 }
   0xe   :  { %p412_p5 = scmp.ne.s32.totalorder %s18_s15, %s411_s19  ;;  %p417_p7 = scmp.lt.s32.totalorder %s411_s19, %s411_s19 }
  0x10   :  { %p418_p8 = por %p417_p7, %p416_p6 }
  0x12   :  { %p419_p9 = pnand %p418_p8, %p412_p5 }
  0x14   :  { %422 = shalt.err (!%p419_p9)
}
  0x15   :  { %20 = dma.hbm_to_vmem [thread:$0]  %s508_s0, 256, %s18_s15, [#allocation3]  }
  0x16   :  { %s471_s22 = smov [#allocation7]  }
  0x17   :  { %s36_s23 = sshll.u32 %s471_s22, 4  ;;  %s37_s23 = int_to_ptr.vmem [resolvable:$true] %s36_s23 }
  0x18   :  { %s431_s24 = scalar_lea.vmem %s37_s23, 8192  ;;  %p436_p11 = scmp.lt.s32.totalorder %s37_s23, %s37_s23 }
  0x19   :  { %p432_p10 = scmp.ne.s32.totalorder %s37_s23, %s431_s24  ;;  %p437_p12 = scmp.lt.s32.totalorder %s431_s24, %s431_s24 }
  0x1b   :  { %p438_p13 = por %p437_p12, %p436_p11 }
  0x1d   :  { %p439_p0 = pnand %p438_p13, %p432_p10 }
  0x1f   :  { %442 = shalt.err (!%p439_p0)
}
  0x20   :  { %s472_s1 = smov 256   ;;  %s473_s25 = smov 16  }
  0x21   :  { %42 = dma.hbm_to_vmem [thread:$0]  %s510_s2, 8192, %s37_s23, [#allocation6], %s472_s1, %s472_s1, %s473_s25  }
  0x22   :  { %463 = dma.done.wait [#allocation3], 256  }
  0x23   :  { %464 = vsyncadd [#allocation3], 4294967040 }
  0x24   :  { %465 = dma.done.wait [#allocation6], 8448  }
  0x25   :  { %466 = vsyncadd [#allocation6], 4294958848  ;;  %v87_v0 = vld [vmem:[#allocation7 + $0xf8] sm:$0xff]  ;;  %v86_v1 = vld [vmem:[#allocation7 + $0xf0] sm:$0xff]  ;;  %s475_s0 = smov [#allocation8]  }
  0x26   :  { %v85_v2 = vld [vmem:[#allocation7 + $0xe8] sm:$0xff]  ;;  %126 = vmatprep.subr.mxu0 %v87_v0  ;;  %308 = vmatprep.subr.mxu1 %v87_v0  ;;  %v84_v3 = vld [vmem:[#allocation7 + $0xe0] sm:$0xff]  ;;  %v83_v4 = vld [vmem:[#allocation7 + $0xd8] sm:$0xff]  ;;  %s298_s2 = sshll.u32 %s475_s0, 4  ;;  %s299_s2 = int_to_ptr.vmem [resolvable:$true] %s298_s2 }
  0x27   :  { %127 = vmatpush1.msra.mxu0 %v86_v1  ;;  %340 = vmatpush1.msra.mxu1 %v86_v1  ;;  %v82_v5 = vld [vmem:[#allocation7 + $0xd0] sm:$0xff]  ;;  %v81_v6 = vld [vmem:[#allocation7 + $0xc8] sm:$0xff]  ;;  %v80_v7 = vld [vmem:[#allocation7 + $0xc0] sm:$0xff]  ;;  %s443_s28 = scalar_lea.vmem %s299_s2, 32  ;;  %p448_p2 = scmp.lt.s32.totalorder %s299_s2, %s299_s2 }
  0x28   :  { %128 = vmatprep.subr.mxu0 %v85_v2  ;;  %309 = vmatprep.subr.mxu1 %v85_v2  ;;  %v79_v8 = vld [vmem:[#allocation7 + $0xb8] sm:$0xff]  ;;  %v78_v9 = vld [vmem:[#allocation7 + $0xb0] sm:$0xff]  ;;  %v77_v10 = vld [vmem:[#allocation7 + $0xa8] sm:$0xff]  ;;  %p444_p1 = scmp.ne.s32.totalorder %s299_s2, %s443_s28  ;;  %p449_p3 = scmp.lt.s32.totalorder %s443_s28, %s443_s28 }
  0x29   :  { %129 = vmatpush1.msra.mxu0 %v84_v3  ;;  %341 = vmatpush1.msra.mxu1 %v84_v3  ;;  %v76_v11 = vld [vmem:[#allocation7 + $0xa0] sm:$0xff]  ;;  %v75_v12 = vld [vmem:[#allocation7 + $0x98] sm:$0xff]  ;;  %v74_v13 = vld [vmem:[#allocation7 + $0x90] sm:$0xff] }
  0x2a   :  { %130 = vmatprep.subr.mxu0 %v83_v4  ;;  %310 = vmatprep.subr.mxu1 %v83_v4  ;;  %v73_v14 = vld [vmem:[#allocation7 + $0x88] sm:$0xff]  ;;  %v72_v15 = vld [vmem:[#allocation7 + $0x80] sm:$0xff]  ;;  %v71_v16 = vld [vmem:[#allocation7 + $0x78] sm:$0xff]  ;;  %p450_p4 = por %p449_p3, %p448_p2 }
  0x2b   :  { %131 = vmatpush1.msra.mxu0 %v82_v5  ;;  %342 = vmatpush1.msra.mxu1 %v82_v5  ;;  %v70_v17 = vld [vmem:[#allocation7 + $0x70] sm:$0xff]  ;;  %v69_v18 = vld [vmem:[#allocation7 + $0x68] sm:$0xff]  ;;  %v68_v19 = vld [vmem:[#allocation7 + $0x60] sm:$0xff] }
  0x2c   :  { %132 = vmatprep.subr.mxu0 %v81_v6  ;;  %311 = vmatprep.subr.mxu1 %v81_v6  ;;  %v67_v20 = vld [vmem:[#allocation7 + $0x58] sm:$0xff]  ;;  %v66_v21 = vld [vmem:[#allocation7 + $0x50] sm:$0xff]  ;;  %v65_v22 = vld [vmem:[#allocation7 + $0x48] sm:$0xff]  ;;  %p451_p5 = pnand %p450_p4, %p444_p1 }
  0x2d   :  { %133 = vmatpush1.msra.mxu0 %v80_v7  ;;  %343 = vmatpush1.msra.mxu1 %v80_v7  ;;  %v64_v23 = vld [vmem:[#allocation7 + $0x40] sm:$0xff]  ;;  %v63_v24 = vld [vmem:[#allocation7 + $0x38] sm:$0xff]  ;;  %v62_v25 = vld [vmem:[#allocation7 + $0x30] sm:$0xff] }
  0x2e   :  { %134 = vmatprep.subr.mxu0 %v79_v8  ;;  %312 = vmatprep.subr.mxu1 %v79_v8  ;;  %v61_v26 = vld [vmem:[#allocation7 + $0x28] sm:$0xff]  ;;  %v60_v27 = vld [vmem:[#allocation7 + $0x20] sm:$0xff]  ;;  %v59_v28 = vld [vmem:[#allocation7 + $0x18] sm:$0xff] }
  0x2f   :  { %135 = vmatpush1.msra.mxu0 %v78_v9  ;;  %344 = vmatpush1.msra.mxu1 %v78_v9  ;;  %v58_v29 = vld [vmem:[#allocation7 + $0x10] sm:$0xff]  ;;  %v57_v30 = vld [vmem:[#allocation7 + $0x8] sm:$0xff]  ;;  %v56_v31 = vld [vmem:[#allocation7] sm:$0xff] }
  0x30   :  { %136 = vmatprep.subr.mxu0 %v77_v10  ;;  %313 = vmatprep.subr.mxu1 %v77_v10  ;;  %v119_v32 = vld [vmem:[#allocation7 + $0x1f8] sm:$0xff]  ;;  %v118_v33 = vld [vmem:[#allocation7 + $0x1f0] sm:$0xff]  ;;  %v117_v34 = vld [vmem:[#allocation7 + $0x1e8] sm:$0xff] }
  0x31   :  { %137 = vmatpush1.msra.mxu0 %v76_v11  ;;  %345 = vmatpush1.msra.mxu1 %v76_v11  ;;  %v116_v35 = vld [vmem:[#allocation7 + $0x1e0] sm:$0xff]  ;;  %v115_v36 = vld [vmem:[#allocation7 + $0x1d8] sm:$0xff]  ;;  %v114_v37 = vld [vmem:[#allocation7 + $0x1d0] sm:$0xff] }
  0x32   :  { %138 = vmatprep.subr.mxu0 %v75_v12  ;;  %314 = vmatprep.subr.mxu1 %v75_v12  ;;  %v113_v38 = vld [vmem:[#allocation7 + $0x1c8] sm:$0xff]  ;;  %v112_v39 = vld [vmem:[#allocation7 + $0x1c0] sm:$0xff]  ;;  %v111_v40 = vld [vmem:[#allocation7 + $0x1b8] sm:$0xff] }
  0x33   :  { %139 = vmatpush1.msra.mxu0 %v74_v13  ;;  %346 = vmatpush1.msra.mxu1 %v74_v13  ;;  %v110_v41 = vld [vmem:[#allocation7 + $0x1b0] sm:$0xff]  ;;  %v109_v42 = vld [vmem:[#allocation7 + $0x1a8] sm:$0xff]  ;;  %v108_v43 = vld [vmem:[#allocation7 + $0x1a0] sm:$0xff] }
  0x34   :  { %140 = vmatprep.subr.mxu0 %v73_v14  ;;  %315 = vmatprep.subr.mxu1 %v73_v14  ;;  %v107_v44 = vld [vmem:[#allocation7 + $0x198] sm:$0xff]  ;;  %v106_v45 = vld [vmem:[#allocation7 + $0x190] sm:$0xff]  ;;  %v105_v46 = vld [vmem:[#allocation7 + $0x188] sm:$0xff] }
  0x35   :  { %141 = vmatpush1.msra.mxu0 %v72_v15  ;;  %347 = vmatpush1.msra.mxu1 %v72_v15  ;;  %v104_v47 = vld [vmem:[#allocation7 + $0x180] sm:$0xff]  ;;  %v103_v48 = vld [vmem:[#allocation7 + $0x178] sm:$0xff]  ;;  %v102_v49 = vld [vmem:[#allocation7 + $0x170] sm:$0xff] }
  0x36   :  { %142 = vmatprep.subr.mxu0 %v71_v16  ;;  %316 = vmatprep.subr.mxu1 %v71_v16  ;;  %v101_v50 = vld [vmem:[#allocation7 + $0x168] sm:$0xff]  ;;  %v100_v51 = vld [vmem:[#allocation7 + $0x160] sm:$0xff]  ;;  %v99_v52 = vld [vmem:[#allocation7 + $0x158] sm:$0xff] }
  0x37   :  { %143 = vmatpush1.msra.mxu0 %v70_v17  ;;  %348 = vmatpush1.msra.mxu1 %v70_v17  ;;  %v98_v53 = vld [vmem:[#allocation7 + $0x150] sm:$0xff]  ;;  %v97_v54 = vld [vmem:[#allocation7 + $0x148] sm:$0xff]  ;;  %v96_v55 = vld [vmem:[#allocation7 + $0x140] sm:$0xff] }
  0x38   :  { %144 = vmatprep.subr.mxu0 %v69_v18  ;;  %317 = vmatprep.subr.mxu1 %v69_v18  ;;  %v95_v56 = vld [vmem:[#allocation7 + $0x138] sm:$0xff]  ;;  %v94_v57 = vld [vmem:[#allocation7 + $0x130] sm:$0xff]  ;;  %v93_v58 = vld [vmem:[#allocation7 + $0x128] sm:$0xff] }
  0x39   :  { %145 = vmatpush1.msra.mxu0 %v68_v19  ;;  %349 = vmatpush1.msra.mxu1 %v68_v19  ;;  %v92_v59 = vld [vmem:[#allocation7 + $0x120] sm:$0xff]  ;;  %v91_v60 = vld [vmem:[#allocation7 + $0x118] sm:$0xff]  ;;  %v90_v61 = vld [vmem:[#allocation7 + $0x110] sm:$0xff] }
  0x3a   :  { %146 = vmatprep.subr.mxu0 %v67_v20  ;;  %318 = vmatprep.subr.mxu1 %v67_v20  ;;  %v55_v62 = vld [vmem:[#allocation5 + $0x8] sm:$0xff]  ;;  %v89_v63 = vld [vmem:[#allocation7 + $0x108] sm:$0xff]  ;;  %v54_v1 = vld [vmem:[#allocation5] sm:$0xff] }
  0x3b   :  { %147 = vmatpush1.msra.mxu0 %v66_v21  ;;  %350 = vmatpush1.msra.mxu1 %v66_v21  ;;  %v53_v0 = vld [vmem:[#allocation2 + $0x8] sm:$0xff]  ;;  %v88_v2 = vld [vmem:[#allocation7 + $0x100] sm:$0xff]  ;;  %v123_v4 = vmul.f32 %v55_v62, %v55_v62  ;;  %v122_v5 = vmul.f32 %v54_v1, %v54_v1 }
  0x3c   :  { %148 = vmatprep.subr.mxu0 %v65_v22  ;;  %319 = vmatprep.subr.mxu1 %v65_v22  ;;  %v52_v3 = vld [vmem:[#allocation2] sm:$0xff]  ;;  %v125_v6 = vmul.f32 %v55_v62, %v53_v0  ;;  %v121_v7 = vmul.f32 %v53_v0, %v53_v0 }
  0x3d   :  { %149 = vmatpush1.msra.mxu0 %v64_v23  ;;  %351 = vmatpush1.msra.mxu1 %v64_v23  ;;  %v124_v8 = vmul.f32 %v54_v1, %v52_v3  ;;  %v120_v9 = vmul.f32 %v52_v3, %v52_v3 }
  0x3e   :  { %150 = vmatprep.subr.mxu0 %v63_v24  ;;  %320 = vmatprep.subr.mxu1 %v63_v24 }
  0x3f   :  { %151 = vmatpush1.msra.mxu0 %v62_v25  ;;  %352 = vmatpush1.msra.mxu1 %v62_v25 }
  0x40   :  { %152 = vmatprep.subr.mxu0 %v61_v26  ;;  %321 = vmatprep.subr.mxu1 %v61_v26 }
  0x41   :  { %153 = vmatpush1.msra.mxu0 %v60_v27  ;;  %353 = vmatpush1.msra.mxu1 %v60_v27 }
  0x42   :  { %154 = vmatprep.subr.mxu0 %v59_v28  ;;  %322 = vmatprep.subr.mxu1 %v59_v28 }
  0x43   :  { %155 = vmatpush1.msra.mxu0 %v58_v29  ;;  %354 = vmatpush1.msra.mxu1 %v58_v29 }
  0x44   :  { %156 = vmatprep.subr.mxu0 %v57_v30  ;;  %323 = vmatprep.subr.mxu1 %v57_v30 }
  0x45   :  { %157 = vmatpush1.msra.mxu0 %v56_v31  ;;  %355 = vmatpush1.msra.mxu1 %v56_v31 }
  0x46   :  { %158 = vmatprep.subr.mxu0 %v119_v32  ;;  %324 = vmatprep.subr.mxu1 %v119_v32 }
  0x47   :  { %159 = vmatpush2.msra.mxu0 %v118_v33  ;;  %356 = vmatpush2.msra.mxu1 %v118_v33 }
  0x48   :  { %160 = vmatprep.subr.mxu0 %v117_v34  ;;  %325 = vmatprep.subr.mxu1 %v117_v34 }
  0x49   :  { %161 = vmatpush2.msra.mxu0 %v116_v35  ;;  %357 = vmatpush2.msra.mxu1 %v116_v35 }
  0x4a   :  { %162 = vmatprep.subr.mxu0 %v115_v36  ;;  %326 = vmatprep.subr.mxu1 %v115_v36 }
  0x4b   :  { %163 = vmatpush2.msra.mxu0 %v114_v37  ;;  %358 = vmatpush2.msra.mxu1 %v114_v37 }
  0x4c   :  { %164 = vmatprep.subr.mxu0 %v113_v38  ;;  %327 = vmatprep.subr.mxu1 %v113_v38 }
  0x4d   :  { %165 = vmatpush2.msra.mxu0 %v112_v39  ;;  %359 = vmatpush2.msra.mxu1 %v112_v39 }
  0x4e   :  { %166 = vmatprep.subr.mxu0 %v111_v40  ;;  %328 = vmatprep.subr.mxu1 %v111_v40 }
  0x4f   :  { %167 = vmatpush2.msra.mxu0 %v110_v41  ;;  %360 = vmatpush2.msra.mxu1 %v110_v41 }
  0x50   :  { %168 = vmatprep.subr.mxu0 %v109_v42  ;;  %329 = vmatprep.subr.mxu1 %v109_v42 }
  0x51   :  { %169 = vmatpush2.msra.mxu0 %v108_v43  ;;  %361 = vmatpush2.msra.mxu1 %v108_v43 }
  0x52   :  { %170 = vmatprep.subr.mxu0 %v107_v44  ;;  %330 = vmatprep.subr.mxu1 %v107_v44 }
  0x53   :  { %171 = vmatpush2.msra.mxu0 %v106_v45  ;;  %362 = vmatpush2.msra.mxu1 %v106_v45 }
  0x54   :  { %172 = vmatprep.subr.mxu0 %v105_v46  ;;  %331 = vmatprep.subr.mxu1 %v105_v46 }
  0x55   :  { %173 = vmatpush2.msra.mxu0 %v104_v47  ;;  %363 = vmatpush2.msra.mxu1 %v104_v47 }
  0x56   :  { %174 = vmatprep.subr.mxu0 %v103_v48  ;;  %332 = vmatprep.subr.mxu1 %v103_v48 }
  0x57   :  { %175 = vmatpush2.msra.mxu0 %v102_v49  ;;  %364 = vmatpush2.msra.mxu1 %v102_v49 }
  0x58   :  { %176 = vmatprep.subr.mxu0 %v101_v50  ;;  %333 = vmatprep.subr.mxu1 %v101_v50 }
  0x59   :  { %177 = vmatpush2.msra.mxu0 %v100_v51  ;;  %365 = vmatpush2.msra.mxu1 %v100_v51 }
  0x5a   :  { %178 = vmatprep.subr.mxu0 %v99_v52  ;;  %334 = vmatprep.subr.mxu1 %v99_v52 }
  0x5b   :  { %179 = vmatpush2.msra.mxu0 %v98_v53  ;;  %366 = vmatpush2.msra.mxu1 %v98_v53 }
  0x5c   :  { %180 = vmatprep.subr.mxu0 %v97_v54  ;;  %335 = vmatprep.subr.mxu1 %v97_v54 }
  0x5d   :  { %181 = vmatpush2.msra.mxu0 %v96_v55  ;;  %367 = vmatpush2.msra.mxu1 %v96_v55 }
  0x5e   :  { %182 = vmatprep.subr.mxu0 %v95_v56  ;;  %336 = vmatprep.subr.mxu1 %v95_v56 }
  0x5f   :  { %183 = vmatpush2.msra.mxu0 %v94_v57  ;;  %368 = vmatpush2.msra.mxu1 %v94_v57 }
  0x60   :  { %184 = vmatprep.subr.mxu0 %v93_v58  ;;  %337 = vmatprep.subr.mxu1 %v93_v58 }
  0x61   :  { %185 = vmatpush2.msra.mxu0 %v92_v59  ;;  %369 = vmatpush2.msra.mxu1 %v92_v59 }
  0x62   :  { %186 = vmatprep.subr.mxu0 %v91_v60  ;;  %338 = vmatprep.subr.mxu1 %v91_v60  ;;  %v474_v60 = vmov 1966171168  }
  0x63   :  { %187 = vmatpush2.msra.mxu0 %v90_v61  ;;  %370 = vmatpush2.msra.mxu1 %v90_v61  ;;  %v273_v61 = vunpack.c.l.s4 %v474_v60 }
  0x64   :  { %188 = vmatprep.subr.mxu0 %v89_v63  ;;  %190 = vmatprep.mubr.f32.mxu0 %v53_v0 }
  0x65   :  { %189 = vmatpush2.msra.mxu0 %v88_v2  ;;  %339 = vmatprep.subr.mxu1 %v89_v63 }
  0x66   :  { %191 = vmatmul.mubr.f32.vlgmr.msra.gmra.mxu0 %v52_v3  ;;  %371 = vmatpush2.msra.mxu1 %v88_v2  ;;  %v274_v3 = vunpack.c.0.s8 %v273_v61 }
  0x67   :  { %208 = vmatprep.mubr.f32.mxu1 %v123_v4  ;;  %196 = vmatprep.mubr.f32.mxu0 %v55_v62  ;;  %v275_v62 = vlaneseq }
  0x68   :  { %209 = vmatmul.mubr.f32.vlgmr.msra.gmra.mxu1 %v122_v5 }
  0x69   :  { %214 = vmatprep.mubr.f32.mxu1 %v125_v6  ;;  %v276_v4 = vshrl.u32 %v275_v62, 7  ;;  %vm289_vm0 = vcmp.lt.s32.totalorder %v275_v62, 256 }
  0x6a   :  { %197 = vmatmul.mubr.f32.gmra.mxu0 %v54_v1 }
  0x6b   :  { %202 = vmatprep.mubr.f32.mxu0 %v121_v7 }
  0x6c   :  { %215 = vmatmul.mubr.f32.gmra.mxu1 %v124_v8 }
  0x6e   :  { %203 = vmatmul.mubr.f32.gmra.mxu0 %v120_v9  ;;  %v277_v9 = vsub.s32 %v274_v3, %v276_v4 }
 0x126   :  { %v192_v10 = vpop.f32.mrf.mxu0 }
 0x127   :  { %v221_v17 = vmul.f32 %v192_v10, %v192_v10 }
 0x128   :  { %v194_v11 = vpop.f32.mrf.mxu0  ;;  %v210_v12 = vpop.f32.mrf.mxu1 }
 0x129   :  { %v222_v20 = vmul.f32 %v194_v11, %v194_v11 }
 0x12a   :  { %v198_v13 = vpop.f32.mrf.mxu0  ;;  %v212_v18 = vpop.f32.mrf.mxu1 }
 0x12b   :  { %v223_v14 = vmul.f32 %v198_v13, %v198_v13  ;;  %v225_v31 = vmul.f32 %v198_v13, %v192_v10 }
 0x12c   :  { %v200_v15 = vpop.f32.mrf.mxu0  ;;  %v216_v28 = vpop.f32.mrf.mxu1 }
 0x12d   :  { %v224_v16 = vmul.f32 %v200_v15, %v200_v15  ;;  %v229_v21 = vsub.f32 %v210_v12, %v223_v14  ;;  %v243_v22 = vadd.f32 %v223_v14, %v221_v17  ;;  %v226_v34 = vmul.f32 %v200_v15, %v194_v11 }
 0x12e   :  { %v204_v19 = vpop.f32.mrf.mxu0  ;;  %v218_v38 = vpop.f32.mrf.mxu1  ;;  %v231_v40 = vsub.f32 %v216_v28, %v225_v31  ;;  %v233_v44 = vmul.f32 2.0, %v225_v31 }
 0x12f   :  { %v227_v23 = vsub.f32 %v204_v19, %v221_v17  ;;  %v230_v25 = vsub.f32 %v212_v18, %v224_v16  ;;  %v244_v26 = vadd.f32 %v224_v16, %v222_v20  ;;  %v245_v32 = vadd.f32 0.0001, %v243_v22 }
 0x130   :  { %v206_v24 = vpop.f32.mrf.mxu0  ;;  %v232_v41 = vsub.f32 %v218_v38, %v226_v34  ;;  %v237_v42 = vmul.f32 2.0, %v231_v40  ;;  %v234_v45 = vmul.f32 2.0, %v226_v34  ;;  %v235_v48 = vadd.f32 0.0001, %v233_v44 }
 0x131   :  { %v228_v27 = vsub.f32 %v206_v24, %v222_v20  ;;  %v247_v29 = vadd.f32 %v229_v21, %v227_v23  ;;  %v246_v35 = vadd.f32 0.0001, %v244_v26 }
 0x132   :  { %v238_v43 = vmul.f32 2.0, %v232_v41  ;;  %v239_v46 = vadd.f32 0.0009, %v237_v42  ;;  %v236_v49 = vadd.f32 0.0001, %v234_v45 }
 0x133   :  { %v248_v30 = vadd.f32 %v230_v25, %v228_v27  ;;  %v249_v33 = vadd.f32 0.0009, %v247_v29 }
 0x134   :  { %v240_v47 = vadd.f32 0.0009, %v238_v43  ;;  %v241_v50 = vmul.f32 %v239_v46, %v235_v48 }
 0x135   :  { %v250_v36 = vadd.f32 0.0009, %v248_v30  ;;  %v251_v37 = vmul.f32 %v249_v33, %v245_v32 }
 0x136   :  { %v242_v52 = vmul.f32 %v240_v47, %v236_v49 }
 0x137   :  { %v252_v39 = vmul.f32 %v250_v36, %v246_v35  ;;  %379 = vrcp.f32 %v251_v37 }
 0x139   :  { %381 = vrcp.f32 %v252_v39 }
 0x144   :  { %v380_v51 = vpop.eup %379 }
 0x145   :  { %v254_v54 = vmul.f32 %v380_v51, %v241_v50 }
 0x146   :  { %v382_v53 = vpop.eup %381 }
 0x147   :  { %v256_v55 = vmul.f32 %v382_v53, %v242_v52  ;;  %v257_v56 = vrot.slane %v254_v54, 4 }
 0x149   :  { %v263_v57 = vrot.slane %v256_v55, 4  ;;  %v258_v58 = vadd.f32 %v257_v56, %v254_v54 }
 0x14b   :  { %v264_v59 = vadd.f32 %v263_v57, %v256_v55  ;;  %v259_v63 = vrot.slane %v258_v58, 2 }
 0x14d   :  { %v265_v0 = vrot.slane %v264_v59, 2  ;;  %v260_v1 = vadd.f32 %v259_v63, %v258_v58 }
 0x14f   :  { %v266_v2 = vadd.f32 %v265_v0, %v264_v59  ;;  %v261_v5 = vrot.slane %v260_v1, 1 }
 0x151   :  { %v267_v6 = vrot.slane %v266_v2, 1  ;;  %v262_v7 = vadd.f32 %v261_v5, %v260_v1 }
 0x153   :  { %v268_v8 = vadd.f32 %v267_v6, %v266_v2 }
 0x155   :  { %v271_v10 = vcombine.low %v262_v7, %v268_v8 }
 0x157   :  { %v278_v11 = vrot.slane %v271_v10, %v277_v9 }
 0x159   :  { %v285_v12 = vrot.slane %v278_v11, %v277_v9 }
 0x15b   :  { %291 = vst.msk [vmem:[#allocation8] sm:$0x3] %vm289_vm0, %v285_v12 }
 0x15c   :  { %454 = shalt.err (!%p451_p5)
}
 0x15d   :  { %301 = dma.vmem_to_hbm [thread:$0]  %s299_s2, 32, %s511_s3, [#allocation4]  }
 0x15e   :  { %467 = dma.done.wait [#allocation4], 32  }
 0x15f   :  { %468 = vsyncadd [#allocation4], 4294967264 }
 0x160   :  { %305 = vsyncpa [#allocation3], 1 }
 0x161   :  { %306 = vsyncpa [#allocation6], 1 }
 0x162   :  { %307 = vsyncpa [#allocation4], 1 }

</bundles_post_ra>
